<compile_context>
chip_gen: v6e
topology: v6e:2x2x1
jax: 0.10.0
libtpu: 0.0.40
codegen_flags: <defaults>
</compile_context>

<pallas_src>
import functools
import math

import numpy as np
import jax
import jax.numpy as jnp
from jax.experimental import pallas as pl
from jax.experimental.pallas import tpu as pltpu


# ---------------------------------------------------------------------------
# Generation-aware VMEM budget / tiling
# ---------------------------------------------------------------------------
@functools.lru_cache(maxsize=1)
def _vmem_budget_bytes():
    """Scoped-VMEM budget: generous on v5e/v6e (128 MiB physical), conservative on
    v7x (64 MiB per TensorCore)."""
    try:
        cap = int(pltpu.get_tpu_info().vmem_capacity_bytes)
    except Exception:
        cap = 64 * 1024 * 1024  # unknown -> assume the smallest (v7x-like) budget
    return max(32 * 1024 * 1024, min(cap - 16 * 1024 * 1024, 100 * 1024 * 1024))


@functools.lru_cache(maxsize=1)
def _attn_max_tile():
    # v5e/v6e (>=96 MiB budget): 512 tiles get close to the HBM roofline and halve
    # K/V re-read passes.  v7x (48 MiB budget): stay at 256 so double-buffered K/V +
    # the (TQ, D) output block + wo fit without spills.
    return 512 if _vmem_budget_bytes() >= 96 * 1024 * 1024 else 256


def _tile(n, max_tile):
    """Largest sequence tile <= max_tile that divides n (full n if n is small)."""
    if n <= max_tile:
        return n
    for t in range(max_tile, 15, -1):
        if n % t == 0 and t % 16 == 0:
            return t
    # TODO(synk): ragged N needs in-kernel masking; this full-N fallback can blow VMEM.
    return n


def _const_spec(shape, index_map):
    """BlockSpec for operands whose block index never changes (weights / biases):
    single-buffer them — double buffering a constant block only doubles VMEM."""
    try:
        return pl.BlockSpec(shape, index_map, pipeline_mode=pl.Buffered(1))
    except Exception:  # older jax without pipeline_mode / Buffered
        return pl.BlockSpec(shape, index_map)


# ---------------------------------------------------------------------------
# RoPE tables (host-side, cached -> built once per (N, d_model, h, d_k))
# ---------------------------------------------------------------------------
@functools.lru_cache(maxsize=8)
def rope_tables(N, d_model, h, d_k):
    """cos / sign-folded sin tables (bf16) for interleaved RoPE on the flat feature axis.

    rotate_half(y)[f]*sin[f] = y[f-1]*sin_dn[f] + y[f+1]*sin_up[f]
        sin_dn[f] =  sin[f] if f odd  else 0
        sin_up[f] = -sin[f] if f even else 0
    so the kernel only needs two lane rolls (no permutation matmul).  cos is padded with
    1 and sin with 0 on the un-rotated upper half of each head.  The lane rolls wrap
    across head boundaries / array edges; correctness relies on the zeros above, which
    requires d_k and d_k//2 to be even (asserted).  Tables are bf16 to halve their DMA
    traffic (q/k are written back as bf16 anyway).
    """
    rope_dim = d_k // 2
    assert d_k % 2 == 0 and rope_dim % 2 == 0, "roll-based RoPE needs even d_k and even d_k//2"
    inv_freq = 1.0 / (10000.0 ** (np.arange(0, rope_dim, 2, dtype=np.float32) / rope_dim))
    t = np.arange(N, dtype=np.float32)
    freqs = np.repeat(np.einsum("i,j->ij", t, inv_freq), 2, axis=-1)       # (N, rope_dim)
    cos_head = np.concatenate([np.cos(freqs), np.ones((N, d_k - rope_dim))], axis=-1)
    sin_head = np.concatenate([np.sin(freqs), np.zeros((N, d_k - rope_dim))], axis=-1)
    cos_full = np.tile(cos_head, (1, h)).astype(np.float32)                # (N, d_model)
    sin_full = np.tile(sin_head, (1, h)).astype(np.float32)
    f = np.arange(d_model)
    sin_dn = np.where(f % 2 == 1, sin_full, 0.0)   # multiplies y[f-1]
    sin_up = np.where(f % 2 == 0, -sin_full, 0.0)  # multiplies y[f+1]
    to_bf16 = lambda a: jnp.asarray(a, dtype=jnp.bfloat16)
    return to_bf16(cos_full), to_bf16(sin_dn), to_bf16(sin_up)


# ---------------------------------------------------------------------------
# Kernel 1: fused Q/K/V projection + RoPE
#   n_inputs == 1 : self-attention -> single (TN,D)@(D,3D) matmul, slice q/k/v.
#   n_inputs == 3 : cross-attention -> three dots against slices of the fused weight.
#   The 1/sqrt(d_k) softmax scale is folded into the q columns of wqkv/bqkv host-side.
# ---------------------------------------------------------------------------
def _qkv_rope_kernel(*refs, n_inputs):
    x_refs = refs[:n_inputs]
    wqkv_ref, bqkv_ref, cos_ref, sdn_ref, sup_ref = refs[n_inputs:n_inputs + 5]
    q_ref, k_ref, v_ref = refs[n_inputs + 5:]
    D = q_ref.shape[-1]

    cos = cos_ref[...]
    sdn = sdn_ref[...]
    sup = sup_ref[...]

    def rope(y):                                  # y: (TN, D) f32
        d = y.shape[-1]
        y_dn = pltpu.roll(y, 1, 1)                # y_dn[:, f] = y[:, f-1]  (XLU lane rotate)
        y_up = pltpu.roll(y, d - 1, 1)            # y_up[:, f] = y[:, f+1]
        return y * cos + y_dn * sdn + y_up * sup

    if n_inputs == 1:
        # One MXU weight-push/drain chain, one bf16 cast of x instead of three.
        x = x_refs[0][0].astype(jnp.bfloat16)                              # (TN, D)
        y = jnp.dot(x, wqkv_ref[...], preferred_element_type=jnp.float32)  # (TN, 3D) f32
        y = y + bqkv_ref[...]
        yq, yk, yv = y[:, :D], y[:, D:2 * D], y[:, 2 * D:]
    else:
        def proj(x_ref, lo, hi):
            x = x_ref[0].astype(jnp.bfloat16)
            y = jnp.dot(x, wqkv_ref[:, lo:hi], preferred_element_type=jnp.float32)
            return y + bqkv_ref[:, lo:hi]
        yq = proj(x_refs[0], 0, D)
        yk = proj(x_refs[1], D, 2 * D)
        yv = proj(x_refs[2], 2 * D, 3 * D)

    q_ref[0] = rope(yq).astype(q_ref.dtype)   # scale already folded into wq/bq
    k_ref[0] = rope(yk).astype(k_ref.dtype)
    v_ref[0] = yv.astype(v_ref.dtype)


def pallas_qkv_rope(xs, wqkv, bqkv, cos, sin_dn, sin_up):
    n_inputs = len(xs)
    B, N, D = xs[0].shape
    TN = _tile(N, max_tile=512)
    # Grid (seq-tile, batch): batch innermost so the RoPE table block (indexed only by
    # the seq-tile) stays resident across the batch loop (no per-batch table re-DMA).
    x_spec = pl.BlockSpec((1, TN, D), lambda nt, b: (b, nt, 0))
    w_spec = _const_spec((D, 3 * D), lambda nt, b: (0, 0))
    b_spec = _const_spec((1, 3 * D), lambda nt, b: (0, 0))
    t_spec = pl.BlockSpec((TN, D), lambda nt, b: (nt, 0))
    out_sds = jax.ShapeDtypeStruct((B, N, D), jnp.bfloat16)
    kern = functools.partial(_qkv_rope_kernel, n_inputs=n_inputs)
    # TODO(synk): for very large d_model (> ~2K on v7x) tile the (D,3D) weight along its
    # output columns instead of holding it whole in VMEM.
    return pl.pallas_call(
        kern,
        out_shape=(out_sds, out_sds, out_sds),
        grid=(N // TN, B),
        in_specs=[x_spec] * n_inputs + [w_spec, b_spec, t_spec, t_spec, t_spec],
        out_specs=(x_spec, x_spec, x_spec),
        compiler_params=pltpu.CompilerParams(
            dimension_semantics=("parallel", "parallel"),
            vmem_limit_bytes=_vmem_budget_bytes(),
        ),
    )(*xs, wqkv, bqkv, cos, sin_dn, sin_up)


# ---------------------------------------------------------------------------
# Kernel 2: flash-style attention with fused output projection
#   grid = (batch, q-tile, head, kv-tile); heads are sliced straight out of the
#   (B, N, D) layout by the index_map (no transposes).  Each head's normalized output
#   is written into its lane slice of a (TQ, D) bf16 scratch; the last head does a
#   single (TQ,D)@(D,D) output projection + bias and ONE store to the output block.
#   NOTE: head/kv axes must stay trailing "arbitrary" axes (scratch + output block
#   residency across them is what makes this correct).
# ---------------------------------------------------------------------------
def _attn_outproj_kernel(q_ref, k_ref, v_ref, wo_ref, bo_ref, o_ref,
                         m_sc, l_sc, acc_sc, head_sc, *, h, d_k):
    hd = pl.program_id(2)
    ki = pl.program_id(3)

    @pl.when(ki == 0)
    def _():
        m_sc[...] = jnp.full(m_sc.shape, -jnp.inf, dtype=m_sc.dtype)
        l_sc[...] = jnp.zeros(l_sc.shape, dtype=l_sc.dtype)
        acc_sc[...] = jnp.zeros(acc_sc.shape, dtype=acc_sc.dtype)

    q = q_ref[0]                                                   # (TQ, d_k)  bf16 (pre-scaled)
    k = k_ref[0]                                                   # (TKV, d_k) bf16
    v = v_ref[0]                                                   # (TKV, d_k) bf16
    # 1/sqrt(d_k) already folded into q (via wq/bq) -> no VPU scale pass here.
    s = jax.lax.dot_general(q, k, (((1,), (1,)), ((), ())),
                            preferred_element_type=jnp.float32)    # (TQ, TKV) f32

    m_prev = m_sc[...]
    m_new = jnp.maximum(m_prev, jnp.max(s, axis=-1, keepdims=True))
    alpha = jnp.exp(m_prev - m_new)
    p = jnp.exp(s - m_new)
    l_sc[...] = alpha * l_sc[...] + jnp.sum(p, axis=-1, keepdims=True)
    acc_sc[...] = alpha * acc_sc[...] + jnp.dot(p.astype(v.dtype), v,
                                                preferred_element_type=jnp.float32)
    m_sc[...] = m_new
    # TODO(synk): attention-prob dropout is identity here (eval mode); no in-kernel RNG dropout.

    @pl.when(ki == pl.num_programs(3) - 1)
    def _():
        inv_l = pl.reciprocal(l_sc[...], approx=True)              # EUP slot, nearly free
        head_out = (acc_sc[...] * inv_l).astype(head_sc.dtype)     # (TQ, d_k) bf16

        # Static lane slices (unrolled over heads) -> no dynamic minor-dim indexing.
        for i in range(h):
            @pl.when(hd == i)
            def _(i=i):
                head_sc[:, i * d_k:(i + 1) * d_k] = head_out

        @pl.when(hd == h - 1)
        def _():
            # Single K=D matmul (fills the 256-deep MXU on v6e/v7x) + one output store.
            o_ref[0] = bo_ref[...] + jnp.dot(head_sc[...], wo_ref[...],
                                             preferred_element_type=jnp.float32)


def pallas_attn_outproj(q, k, v, wo, bo, h, d_k):
    B, N, D = q.shape
    assert d_k % 128 == 0 or h == 1, (
        "per-head BlockSpec slicing needs d_k to be a multiple of 128 "
        "(pack multiple heads per block for smaller d_k)")
    max_tile = _attn_max_tile()
    TQ = _tile(N, max_tile)
    TKV = _tile(N, max_tile)   # == N for moderate N -> whole-head K/V resident, 1 kv pass
    kern = functools.partial(_attn_outproj_kernel, h=h, d_k=d_k)
    return pl.pallas_call(
        kern,
        out_shape=jax.ShapeDtypeStruct((B, N, D), jnp.float32),
        grid=(B, N // TQ, h, N // TKV),
        in_specs=[
            pl.BlockSpec((1, TQ, d_k), lambda b, qi, hd, ki: (b, qi, hd)),   # q
            pl.BlockSpec((1, TKV, d_k), lambda b, qi, hd, ki: (b, ki, hd)),  # k
            pl.BlockSpec((1, TKV, d_k), lambda b, qi, hd, ki: (b, ki, hd)),  # v
            _const_spec((D, D), lambda b, qi, hd, ki: (0, 0)),               # wo (whole, 1-buf)
            _const_spec((1, D), lambda b, qi, hd, ki: (0, 0)),               # bo
        ],
        out_specs=pl.BlockSpec((1, TQ, D), lambda b, qi, hd, ki: (b, qi, 0)),
        scratch_shapes=[
            pltpu.VMEM((TQ, 1), jnp.float32),       # running max
            pltpu.VMEM((TQ, 1), jnp.float32),       # running sum
            pltpu.VMEM((TQ, d_k), jnp.float32),     # running PV accumulator
            pltpu.VMEM((TQ, D), jnp.bfloat16),      # concatenated per-head outputs
        ],
        compiler_params=pltpu.CompilerParams(
            dimension_semantics=("parallel", "parallel", "arbitrary", "arbitrary"),
            vmem_limit_bytes=_vmem_budget_bytes(),
        ),
    )(q, k, v, wo, bo)


# ---------------------------------------------------------------------------
# Full forward
# ---------------------------------------------------------------------------
def multi_head_attention_rope(xq, xk, xv, params, h):
    B, N, D = xq.shape
    assert D % h == 0
    d_k = D // h
    scale = 1.0 / math.sqrt(d_k)
    cos, sin_dn, sin_up = rope_tables(N, D, h, d_k)   # cached; built once per shape

    # Fold the softmax scale into wq/bq (RoPE is linear so it commutes), fuse the three
    # projection weights/biases into one (D, 3D)/(1, 3D) operand.  MXU operands bf16,
    # accumulation stays f32 inside the kernels.  (In a real module this prep is done once.)
    wqkv = jnp.concatenate(
        [params["wq"] * scale, params["wk"], params["wv"]], axis=1).astype(jnp.bfloat16)
    bqkv = jnp.concatenate(
        [params["bq"] * scale, params["bk"], params["bv"]], axis=1)          # (1, 3D) f32

    if xq is xk and xk is xv:
        xs = (xq,)          # self-attention (BERT): one fused (TN,D)@(D,3D) matmul
    else:
        xs = (xq, xk, xv)   # cross-attention: three dots against fused-weight slices

    q, k, v = pallas_qkv_rope(xs, wqkv, bqkv, cos, sin_dn, sin_up)
    return pallas_attn_outproj(q, k, v, params["wo"].astype(jnp.bfloat16),
                               params["bo"], h, d_k)


# ---------------------------------------------------------------------------
# Pure-JAX f32 reference (mirrors the torch module structure; independent of the
# roll-based RoPE formulation and the scale folding used in the kernels)
# ---------------------------------------------------------------------------
def reference(xq, xk, xv, params, h):
    B, N, D = xq.shape
    d_k = D // h
    rope_dim = d_k // 2
    inv_freq = 1.0 / (10000.0 ** (np.arange(0, rope_dim, 2, dtype=np.float32) / rope_dim))
    t = np.arange(N, dtype=np.float32)
    freqs = np.repeat(np.einsum("i,j->ij", t, inv_freq), 2, axis=-1).astype(np.float32)
    cos = jnp.asarray(np.cos(freqs))
    sin = jnp.asarray(np.sin(freqs))

    def lin(x, w, b):
        return x @ w + b

    def split(x):  # 'b n (h d) -> b h n d'
        return x.reshape(B, N, h, d_k).transpose(0, 2, 1, 3)

    def rope_head(x):  # x: (B, h, N, d_k); rotate first rope_dim features, interleaved pairs
        x_rot, x_pass = x[..., :rope_dim], x[..., rope_dim:]
        xr = x_rot.reshape(*x_rot.shape[:-1], rope_dim // 2, 2)
        x1, x2 = xr[..., 0], xr[..., 1]
        rot_half = jnp.stack([-x2, x1], axis=-1).reshape(x_rot.shape)
        return jnp.concatenate([x_rot * cos + rot_half * sin, x_pass], axis=-1)

    q = rope_head(split(lin(xq, params["wq"], params["bq"])))
    k = rope_head(split(lin(xk, params["wk"], params["bk"])))
    v = split(lin(xv, params["wv"], params["bv"]))

    s = jnp.einsum("bhnd,bhmd->bhnm", q, k) / math.sqrt(d_k)
    p = jax.nn.softmax(s, axis=-1)
    o = jnp.einsum("bhnm,bhmd->bhnd", p, v)
    o = o.transpose(0, 2, 1, 3).reshape(B, N, D)
    return lin(o, params["wo"], params["bo"])


# ---------------------------------------------------------------------------
if __name__ == "__main__":
    # Small demo shapes; d_model chosen so d_k = d_model // h = 128 (lane-aligned heads).
    B, N, h, d_model = 2, 16, 2, 256
    d_k = d_model // h

    key = jax.random.PRNGKey(0)
    ks = jax.random.split(key, 11)
    wscale = 1.0 / math.sqrt(d_model)
    params = {
        "wq": jax.random.normal(ks[0], (d_model, d_model), jnp.float32) * wscale,
        "bq": jax.random.normal(ks[1], (1, d_model), jnp.float32) * 0.01,
        "wk": jax.random.normal(ks[2], (d_model, d_model), jnp.float32) * wscale,
        "bk": jax.random.normal(ks[3], (1, d_model), jnp.float32) * 0.01,
        "wv": jax.random.normal(ks[4], (d_model, d_model), jnp.float32) * wscale,
        "bv": jax.random.normal(ks[5], (1, d_model), jnp.float32) * 0.01,
        "wo": jax.random.normal(ks[6], (d_model, d_model), jnp.float32) * wscale,
        "bo": jax.random.normal(ks[7], (1, d_model), jnp.float32) * 0.01,
    }
    x = jax.random.normal(ks[8], (B, N, d_model), jnp.float32)
    xk = jax.random.normal(ks[9], (B, N, d_model), jnp.float32)
    xv = jax.random.normal(ks[10], (B, N, d_model), jnp.float32)

    # bf16 MXU operands + bf16 RoPE tables + approximate reciprocal -> loose tolerance.
    tol = dict(rtol=5e-2, atol=7e-2)

    # Self-attention (query is key is value) -> fused single-matmul QKV path.
    out_self = jax.block_until_ready(multi_head_attention_rope(x, x, x, params, h))
    ref_self = jax.block_until_ready(reference(x, x, x, params, h))
    np.testing.assert_allclose(np.asarray(out_self), np.asarray(ref_self), **tol)

    # Cross-attention (distinct query/key/value) -> general three-dot path.
    out_cross = jax.block_until_ready(multi_head_attention_rope(x, xk, xv, params, h))
    ref_cross = jax.block_until_ready(reference(x, xk, xv, params, h))
    np.testing.assert_allclose(np.asarray(out_cross), np.asarray(ref_cross), **tol)

    print("KERNEL_OK")
</pallas_src>

<mosaic_0001>
module attributes {stable_mosaic.version = 11 : i64} {
  func.func @_qkv_rope_kernel(%arg0: i32, %arg1: i32, %arg2: memref<1x16x256xf32, #tpu.memory_space<vmem>>, %arg3: memref<256x768xbf16, #tpu.memory_space<vmem>>, %arg4: memref<1x768xf32, #tpu.memory_space<vmem>>, %arg5: memref<16x256xbf16, #tpu.memory_space<vmem>>, %arg6: memref<16x256xbf16, #tpu.memory_space<vmem>>, %arg7: memref<16x256xbf16, #tpu.memory_space<vmem>>, %arg8: memref<1x16x256xbf16, #tpu.memory_space<vmem>>, %arg9: memref<1x16x256xbf16, #tpu.memory_space<vmem>>, %arg10: memref<1x16x256xbf16, #tpu.memory_space<vmem>>) attributes {dimension_semantics = [#tpu.dimension_semantics<parallel>, #tpu.dimension_semantics<parallel>], iteration_bounds = array<i64: 1, 2>, scalar_prefetch = 0 : i64, scratch_operands = 0 : i64, tpu.core_type = #tpu.core_type<tc>, window_params = [{transform_indices = @transform_0, window_bounds = array<i64: 1, 16, 256>}, {pipeline_mode = #tpu.pipeline_mode<synchronous>, transform_indices = @transform_1, window_bounds = array<i64: 256, 768>}, {pipeline_mode = #tpu.pipeline_mode<synchronous>, transform_indices = @transform_2, window_bounds = array<i64: 1, 768>}, {transform_indices = @transform_3, window_bounds = array<i64: 16, 256>}, {transform_indices = @transform_4, window_bounds = array<i64: 16, 256>}, {transform_indices = @transform_5, window_bounds = array<i64: 16, 256>}, {transform_indices = @transform_6, window_bounds = array<i64: 1, 16, 256>}, {transform_indices = @transform_7, window_bounds = array<i64: 1, 16, 256>}, {transform_indices = @transform_8, window_bounds = array<i64: 1, 16, 256>}]} {
    %c0 = arith.constant 0 : index
    %c0_0 = arith.constant 0 : index
    %0 = vector.load %arg5[%c0, %c0_0] : memref<16x256xbf16, #tpu.memory_space<vmem>>, vector<16x256xbf16>
    %c0_1 = arith.constant 0 : index
    %c0_2 = arith.constant 0 : index
    %1 = vector.load %arg6[%c0_1, %c0_2] : memref<16x256xbf16, #tpu.memory_space<vmem>>, vector<16x256xbf16>
    %c0_3 = arith.constant 0 : index
    %c0_4 = arith.constant 0 : index
    %2 = vector.load %arg7[%c0_3, %c0_4] : memref<16x256xbf16, #tpu.memory_space<vmem>>, vector<16x256xbf16>
    %c0_5 = arith.constant 0 : index
    %c0_6 = arith.constant 0 : index
    %c0_7 = arith.constant 0 : index
    %3 = vector.load %arg2[%c0_5, %c0_6, %c0_7] : memref<1x16x256xf32, #tpu.memory_space<vmem>>, vector<1x16x256xf32>
    %4 = vector.shape_cast %3 : vector<1x16x256xf32> to vector<16x256xf32>
    %5 = arith.truncf %4 : vector<16x256xf32> to vector<16x256xbf16>
    %c0_8 = arith.constant 0 : index
    %c0_9 = arith.constant 0 : index
    %6 = vector.load %arg3[%c0_8, %c0_9] : memref<256x768xbf16, #tpu.memory_space<vmem>>, vector<256x768xbf16>
    %cst = arith.constant dense<0.000000e+00> : vector<16x768xf32>
    %7 = tpu.matmul %5, %6, %cst {dimension_numbers = #tpu.dot_dimension_numbers<[1], [0], [0], [1], [0, 0, 1, 1], [], []>} : vector<16x256xbf16>, vector<256x768xbf16>, vector<16x768xf32> -> vector<16x768xf32>
    %c0_10 = arith.constant 0 : index
    %c0_11 = arith.constant 0 : index
    %8 = vector.load %arg4[%c0_10, %c0_11] : memref<1x768xf32, #tpu.memory_space<vmem>>, vector<1x768xf32>
    %9 = vector.broadcast %8 : vector<1x768xf32> to vector<16x768xf32>
    %10 = arith.addf %7, %9 : vector<16x768xf32>
    %11 = vector.extract_strided_slice %10 {offsets = [0, 0], sizes = [16, 256], strides = [1, 1]} : vector<16x768xf32> to vector<16x256xf32>
    %12 = vector.extract_strided_slice %10 {offsets = [0, 256], sizes = [16, 256], strides = [1, 1]} : vector<16x768xf32> to vector<16x256xf32>
    %13 = vector.extract_strided_slice %10 {offsets = [0, 512], sizes = [16, 256], strides = [1, 1]} : vector<16x768xf32> to vector<16x256xf32>
    %c1_i32 = arith.constant 1 : i32
    %14 = tpu.dynamic_rotate %11 by %c1_i32 dim 1 : vector<16x256xf32>, i32 -> vector<16x256xf32>
    %c255_i32 = arith.constant 255 : i32
    %15 = tpu.dynamic_rotate %11 by %c255_i32 dim 1 : vector<16x256xf32>, i32 -> vector<16x256xf32>
    %16 = arith.extf %0 : vector<16x256xbf16> to vector<16x256xf32>
    %17 = arith.mulf %11, %16 : vector<16x256xf32>
    %18 = arith.extf %1 : vector<16x256xbf16> to vector<16x256xf32>
    %19 = arith.mulf %14, %18 : vector<16x256xf32>
    %20 = arith.addf %17, %19 : vector<16x256xf32>
    %21 = arith.extf %2 : vector<16x256xbf16> to vector<16x256xf32>
    %22 = arith.mulf %15, %21 : vector<16x256xf32>
    %23 = arith.addf %20, %22 : vector<16x256xf32>
    %24 = arith.truncf %23 : vector<16x256xf32> to vector<16x256xbf16>
    %c0_12 = arith.constant 0 : index
    %c0_13 = arith.constant 0 : index
    %c0_14 = arith.constant 0 : index
    %25 = vector.load %arg8[%c0_12, %c0_13, %c0_14] : memref<1x16x256xbf16, #tpu.memory_space<vmem>>, vector<1x16x256xbf16>
    %26 = vector.shape_cast %25 : vector<1x16x256xbf16> to vector<16x256xbf16>
    %27 = vector.shape_cast %24 : vector<16x256xbf16> to vector<1x16x256xbf16>
    tpu.vector_store %arg8[%c0_12, %c0_13, %c0_14], %27 {strides = array<i32>} : memref<1x16x256xbf16, #tpu.memory_space<vmem>>, vector<1x16x256xbf16>,
    %c1_i32_15 = arith.constant 1 : i32
    %28 = tpu.dynamic_rotate %12 by %c1_i32_15 dim 1 : vector<16x256xf32>, i32 -> vector<16x256xf32>
    %c255_i32_16 = arith.constant 255 : i32
    %29 = tpu.dynamic_rotate %12 by %c255_i32_16 dim 1 : vector<16x256xf32>, i32 -> vector<16x256xf32>
    %30 = arith.extf %0 : vector<16x256xbf16> to vector<16x256xf32>
    %31 = arith.mulf %12, %30 : vector<16x256xf32>
    %32 = arith.extf %1 : vector<16x256xbf16> to vector<16x256xf32>
    %33 = arith.mulf %28, %32 : vector<16x256xf32>
    %34 = arith.addf %31, %33 : vector<16x256xf32>
    %35 = arith.extf %2 : vector<16x256xbf16> to vector<16x256xf32>
    %36 = arith.mulf %29, %35 : vector<16x256xf32>
    %37 = arith.addf %34, %36 : vector<16x256xf32>
    %38 = arith.truncf %37 : vector<16x256xf32> to vector<16x256xbf16>
    %c0_17 = arith.constant 0 : index
    %c0_18 = arith.constant 0 : index
    %c0_19 = arith.constant 0 : index
    %39 = vector.load %arg9[%c0_17, %c0_18, %c0_19] : memref<1x16x256xbf16, #tpu.memory_space<vmem>>, vector<1x16x256xbf16>
    %40 = vector.shape_cast %39 : vector<1x16x256xbf16> to vector<16x256xbf16>
    %41 = vector.shape_cast %38 : vector<16x256xbf16> to vector<1x16x256xbf16>
    tpu.vector_store %arg9[%c0_17, %c0_18, %c0_19], %41 {strides = array<i32>} : memref<1x16x256xbf16, #tpu.memory_space<vmem>>, vector<1x16x256xbf16>,
    %42 = arith.truncf %13 : vector<16x256xf32> to vector<16x256xbf16>
    %c0_20 = arith.constant 0 : index
    %c0_21 = arith.constant 0 : index
    %c0_22 = arith.constant 0 : index
    %43 = vector.load %arg10[%c0_20, %c0_21, %c0_22] : memref<1x16x256xbf16, #tpu.memory_space<vmem>>, vector<1x16x256xbf16>
    %44 = vector.shape_cast %43 : vector<1x16x256xbf16> to vector<16x256xbf16>
    %45 = vector.shape_cast %42 : vector<16x256xbf16> to vector<1x16x256xbf16>
    tpu.vector_store %arg10[%c0_20, %c0_21, %c0_22], %45 {strides = array<i32>} : memref<1x16x256xbf16, #tpu.memory_space<vmem>>, vector<1x16x256xbf16>,
    return
  }
  func.func @transform_0(%arg0: i32, %arg1: i32) -> (i32, i32, i32) {
    %c0_i32 = arith.constant 0 : i32
    %c0_i32_0 = arith.constant 0 : i32
    return %arg1, %arg0, %c0_i32 : i32, i32, i32
  }
  func.func @transform_1(%arg0: i32, %arg1: i32) -> (i32, i32) {
    %c0_i32 = arith.constant 0 : i32
    %c0_i32_0 = arith.constant 0 : i32
    %c0_i32_1 = arith.constant 0 : i32
    return %c0_i32, %c0_i32_0 : i32, i32
  }
  func.func @transform_2(%arg0: i32, %arg1: i32) -> (i32, i32) {
    %c0_i32 = arith.constant 0 : i32
    %c0_i32_0 = arith.constant 0 : i32
    %c0_i32_1 = arith.constant 0 : i32
    return %c0_i32, %c0_i32_0 : i32, i32
  }
  func.func @transform_3(%arg0: i32, %arg1: i32) -> (i32, i32) {
    %c0_i32 = arith.constant 0 : i32
    %c0_i32_0 = arith.constant 0 : i32
    return %arg0, %c0_i32 : i32, i32
  }
  func.func @transform_4(%arg0: i32, %arg1: i32) -> (i32, i32) {
    %c0_i32 = arith.constant 0 : i32
    %c0_i32_0 = arith.constant 0 : i32
    return %arg0, %c0_i32 : i32, i32
  }
  func.func @transform_5(%arg0: i32, %arg1: i32) -> (i32, i32) {
    %c0_i32 = arith.constant 0 : i32
    %c0_i32_0 = arith.constant 0 : i32
    return %arg0, %c0_i32 : i32, i32
  }
  func.func @transform_6(%arg0: i32, %arg1: i32) -> (i32, i32, i32) {
    %c0_i32 = arith.constant 0 : i32
    %c0_i32_0 = arith.constant 0 : i32
    return %arg1, %arg0, %c0_i32 : i32, i32, i32
  }
  func.func @transform_7(%arg0: i32, %arg1: i32) -> (i32, i32, i32) {
    %c0_i32 = arith.constant 0 : i32
    %c0_i32_0 = arith.constant 0 : i32
    return %arg1, %arg0, %c0_i32 : i32, i32, i32
  }
  func.func @transform_8(%arg0: i32, %arg1: i32) -> (i32, i32, i32) {
    %c0_i32 = arith.constant 0 : i32
    %c0_i32_0 = arith.constant 0 : i32
    return %arg1, %arg0, %c0_i32 : i32, i32, i32
  }
}

</mosaic_0001>

<bundles_post_ra>
// kernel: tpu_custom_call.1
= control target key start
LH: loop header
LB: loop body
LE: loop exit
PB: predicated region body
PF: predicated region fallthrough
CT: control target
= control target key end

     0   :  { %s2851_s0 = inlined_call_operand.hbm [shape: f32[2,16,256], index: 0, kind: input, shape index: {}]   ;;  %s2852_s1 = inlined_call_operand.hbm [shape: bf16[256,768], index: 1, kind: input, shape index: {}]   ;;  %s2853_s2 = inlined_call_operand.hbm [shape: f32[1,768], index: 2, kind: input, shape index: {}]   ;;  %s2854_s3 = inlined_call_operand.hbm [shape: bf16[16,256], index: 3, kind: input, shape index: {}]   ;;  %s2855_s4 = inlined_call_operand.hbm [shape: bf16[16,256], index: 4, kind: input, shape index: {}]   ;;  %s2856_s5 = inlined_call_operand.hbm [shape: bf16[16,256], index: 5, kind: input, shape index: {}]   ;;  %s2857_s6 = inlined_call_operand.hbm [shape: bf16[2,16,256], index: 6, kind: output, shape index: {0}]   ;;  %s2858_s7 = inlined_call_operand.hbm [shape: bf16[2,16,256], index: 7, kind: output, shape index: {1}]   ;;  %s2859_s8 = inlined_call_operand.hbm [shape: bf16[2,16,256], index: 8, kind: output, shape index: {2}]  }
   0x1   :  { %2863 = sst [smem:[#allocation23_spill]] %s2852_s1 }
   0x2   :  { %2864 = sst [smem:[#allocation24_spill]] %s2853_s2 }
   0x3   :  { %2865 = sst [smem:[#allocation25_spill]] %s2854_s3 }
   0x4   :  { %2866 = sst [smem:[#allocation26_spill]] %s2855_s4 }
   0x5   :  { %2867 = sst [smem:[#allocation27_spill]] %s2856_s5 }
   0x6   :  { %14 = vsyncpa [#allocation3], 0 }
   0x7   :  { %16 = vsyncpa [#allocation3 + $0x1], 0 }
   0x8   :  { %17 = vsyncpa [#allocation6], 0 }
   0x9   :  { %18 = vsyncpa [#allocation9], 0 }
   0xa   :  { %19 = vsyncpa [#allocation12], 0 }
   0xb   :  { %20 = vsyncpa [#allocation4], 0 }
   0xc   :  { %22 = vsyncpa [#allocation4 + $0x1], 0 }
   0xd   :  { %23 = vsyncpa [#allocation15], 0 }
   0xe   :  { %25 = vsyncpa [#allocation15 + $0x1], 0  ;;  %s2432_s27 = smov 0   ;;  %s2434_s28 = smov 0  }
   0xf   :  { %s2436_s29 = smov 0   ;;  %s2438_s30 = smov 0  }
  0x10   :  { %s2440_s9 = smov 0   ;;  %s2442_s10 = smov 0  }
  0x11 LB: > { %s2463_s11 = sadd.s32 4294967295, %s2366_s10   ;;  %p1640_p0 = scmp.ge.s32.totalorder %s2366_s10, 1  ;;  %s2366_s10 = sphi %s2442_s10, %s31_s10   ;;  %s2362_s9 = sphi %s2440_s9, %s2895_s9   ;;  %s2358_s30 = sphi %s2438_s30, %s2894_s30   ;;  %s2354_s29 = sphi %s2436_s29, %s2893_s29   ;;  %s2350_s28 = sphi %s2434_s28, %s2892_s28   ;;  %s2346_s27 = sphi %s2432_s27, %s2891_s27  }
  0x12   : > { %p2860_p1 = scmp.eq.s32.totalorder %s2463_s11, 0  ;;  %p280_p2 = scmp.lt.s32.totalorder %s2366_s10, 3 }
  0x13   : > { %s2368_s13 = smov [#allocation5]   ;;  %s2369_s16 = smov [#allocation8]  }
  0x14   : > { %p2468_p3 = pnand %p1640_p0, %p280_p2  ;;  %s292_s14 = sshll.u32 %s2368_s13, 4  ;;  %s293_s14 = int_to_ptr.vmem [resolvable:$true] %s292_s14 }
  0x15   : > { %s320_s17 = sshll.u32 %s2369_s16, 4  ;;  %s2071_s19 = scalar_lea.vmem %s293_s14, 12288  ;;  %s321_s17 = int_to_ptr.vmem [resolvable:$true] %s320_s17 }
  0x16   : > { %s2868_s12 = scalar_select %p2468_p3, 1, 0 }
  0x17   : > { %p1811_p4 = pneg %p2468_p3  ;;  %p2072_p8 = scmp.ne.s32.totalorder %s293_s14, %s2071_s19 }
  0x18   : > { %p2079_p11 = scmp.lt.s32.totalorder %s293_s14, %s293_s14  ;;  %p2080_p12 = scmp.lt.s32.totalorder %s2071_s19, %s2071_s19 }
  0x19   : > { %p2477_p6 = pnand %p1811_p4, %p2860_p1 }
  0x1a   : > { %p2081_p13 = por %p2080_p12, %p2079_p11 }
  0x1b   : > { %p2483_p7 = pneg %p2477_p6 }
  0x1d   : > { %p2074_p9 = pnand %p2072_p8, %p2483_p7 }
  0x1f   : > { %p2075_p10 = pneg %p2074_p9 }
  0x21   : > { %p2082_p0 = pnand %p2081_p13, %p2075_p10 }
  0x23   : > { %2085 = shalt.err (!%p2082_p0)
}
  0x24   : > { %s2370_s20 = smov 384   ;;  %s2371_s21 = smov 24  }
  0x25   : > { %s2871_s1 = sld [smem:[#allocation23_spill]]  ;;  %s2097_s24 = scalar_lea.vmem %s321_s17, 256 }
  0x26   : > { %p2098_p2 = scmp.ne.s32.totalorder %s321_s17, %s2097_s24  ;;  %p2105_p9 = scmp.lt.s32.totalorder %s321_s17, %s321_s17 }
  0x27   : > { %p2106_p5 = scmp.lt.s32.totalorder %s2097_s24, %s2097_s24 }
  0x28   : > { %p2100_p4 = pnand %p2098_p2, %p2483_p7 }
  0x29   : > { %p2107_p1 = por %p2106_p5, %p2105_p9 }
  0x2a   : > { %p2101_p8 = pneg %p2100_p4 }
  0x2b   : > { %1814 = dma.hbm_to_vmem [thread:$0]  (!%p2477_p6), %s2871_s1, 12288, %s293_s14, [#allocation6], %s2370_s20, %s2370_s20, %s2371_s21  }
  0x2c   : > { %p2108_p11 = pnand %p2107_p1, %p2101_p8 }
  0x2e   : > { %2111 = shalt.err (!%p2108_p11)
}
  0x2f   : > { %s2372_s25 = smov 128   ;;  %s2373_s26 = smov 8  }
  0x30   : > { %s2872_s3 = sld [smem:[#allocation25_spill]]  ;;  %s2374_s16 = smov [#allocation7]  }
  0x31   : > { %s306_s19 = sshll.u32 %s2374_s16, 4  ;;  %s2375_s20 = smov [#allocation10]   ;;  %s307_s19 = int_to_ptr.vmem [resolvable:$true] %s306_s19 }
  0x32   : > { %s337_s21 = sshll.u32 %s2375_s20, 4  ;;  %s2123_s22 = scalar_lea.vmem %s307_s19, 96  ;;  %s338_s21 = int_to_ptr.vmem [resolvable:$true] %s337_s21 }
  0x33   : > { %p2124_p1 = scmp.ne.s32.totalorder %s307_s19, %s2123_s22  ;;  %p2131_p12 = scmp.lt.s32.totalorder %s307_s19, %s307_s19 }
  0x34   : > { %p2132_p13 = scmp.lt.s32.totalorder %s2123_s22, %s2123_s22 }
  0x35   : > { %p2126_p5 = pnand %p2124_p1, %p2483_p7 }
  0x36   : > { %1820 = dma.hbm_to_vmem [thread:$0]  (!%p2477_p6), %s2872_s3, 256, %s321_s17, [#allocation9], %s2372_s25, %s2372_s25, %s2373_s26  }
  0x37   : > { %p2127_p10 = pneg %p2126_p5  ;;  %p2133_p0 = por %p2132_p13, %p2131_p12 }
  0x39   : > { %p2134_p2 = pnand %p2133_p0, %p2127_p10 }
  0x3b   : > { %2137 = shalt.err (!%p2134_p2)
}
  0x3c   : > { %s2873_s2 = sld [smem:[#allocation24_spill]]  ;;  %s2149_s24 = scalar_lea.vmem %s338_s21, 256 }
  0x3d   : > { %p2150_p4 = scmp.ne.s32.totalorder %s338_s21, %s2149_s24  ;;  %p2157_p11 = scmp.lt.s32.totalorder %s338_s21, %s338_s21 }
  0x3e   : > { %p2158_p1 = scmp.lt.s32.totalorder %s2149_s24, %s2149_s24 }
  0x3f   : > { %p2152_p8 = pnand %p2150_p4, %p2483_p7 }
  0x40   : > { %p2159_p5 = por %p2158_p1, %p2157_p11 }
  0x41   : > { %p2153_p9 = pneg %p2152_p8 }
  0x42   : > { %1817 = dma.hbm_to_vmem [thread:$0]  (!%p2477_p6), %s2873_s2, 96, %s307_s19, [#allocation6]  }
  0x43   : > { %p2160_p3 = pnand %p2159_p5, %p2153_p9 }
  0x45   : > { %2163 = shalt.err (!%p2160_p3)
}
  0x46   : > { %s2874_s4 = sld [smem:[#allocation26_spill]]  ;;  %s2376_s16 = smov [#allocation11]  }
  0x47   : > { %s354_s19 = sshll.u32 %s2376_s16, 4  ;;  %s355_s19 = int_to_ptr.vmem [resolvable:$true] %s354_s19 }
  0x48   : > { %s2175_s20 = scalar_lea.vmem %s355_s19, 256  ;;  %p2183_p0 = scmp.lt.s32.totalorder %s355_s19, %s355_s19 }
  0x49   : > { %p2176_p10 = scmp.ne.s32.totalorder %s355_s19, %s2175_s20  ;;  %p2184_p3 = scmp.lt.s32.totalorder %s2175_s20, %s2175_s20 }
  0x4b   : > { %p2178_p12 = pnand %p2176_p10, %p2483_p7  ;;  %p2185_p2 = por %p2184_p3, %p2183_p0 }
  0x4c   : > { %1823 = dma.hbm_to_vmem [thread:$0]  (!%p2477_p6), %s2874_s4, 256, %s338_s21, [#allocation9], %s2372_s25, %s2372_s25, %s2373_s26  }
  0x4d   : > { %p2179_p13 = pneg %p2178_p12 }
  0x4f   : > { %p2186_p4 = pnand %p2185_p2, %p2179_p13 }
  0x51   : > { %2189 = shalt.err (!%p2186_p4)
}
  0x52   : > { %s2875_s5 = sld [smem:[#allocation27_spill]]  ;;  %s2862_s15 = sadd.s32 4294967294, %s2366_s10  }
  0x53   : > { %s40_s18 = sadd.s32 1, %s2362_s9  ;;  %s52_s23 = sadd.s32 1, %s2354_s29 }
  0x54   : > { %p41_p7 = scmp.ge.s32.totalorder %s40_s18, 2  ;;  %p59_p8 = scmp.ne.s32.totalorder %s2354_s29, %s2350_s28 }
  0x55   : > { %p60_p9 = scmp.eq.s32.totalorder %s2366_s10, 0  ;;  %p65_p11 = scmp.ne.s32.totalorder %s2350_s28, %s2346_s27 }
  0x56   : > { %s2897_s18 = smov (%p41_p7, %s40_s18), 0  ;;  %p2877_p5 = scmp.eq.s32.totalorder %s2463_s11, 0 }
  0x57   : > { %p2541_p1 = por %p60_p9, %p59_p8  ;;  %p211_p10 = scmp.eq.s32.totalorder %s2463_s11, 1 }
  0x58   : > { %1826 = dma.hbm_to_vmem [thread:$0]  (!%p2477_p6), %s2875_s5, 256, %s355_s19, [#allocation12], %s2372_s25, %s2372_s25, %s2373_s26  }
  0x59   : > { %p2547_p6 = por %p2877_p5, %p65_p11  ;;  %s47_s26 = ssub.s32 %s2362_s9, %s2897_s18 }
  0x5a   : > { %p50_p12 = scmp.eq.s32.totalorder %s47_s26, 0  ;;  %p217_p13 = scmp.eq.s32.totalorder %s2862_s15, 1 }
  0x5b   : > { %p2556_p0 = por %p211_p10, %p59_p8  ;;  %p1846_p3 = scmp.lt.s32.totalorder %s2366_s10, 2 }
  0x5c   : > { %s2562_s13 = scalar_select %p50_p12, %s2354_s29, %s52_s23  }
  0x5d   : > { %p2564_p2 = por %p217_p13, %p65_p11  ;;  %s368_s16 = sand.u32 1, %s2354_s29  }
  0x5e   : > { %s1647_s19 = sshll.u32 %s368_s16, 5  ;;  %s1773_s20 = sshll.u32 %s2362_s9, 9 }
  0x5f   : > { %s381_s26 = scalar_lea.hbm %s2851_s0, %s1773_s20  ;;  %s372_s1 = scalar_lea.vmem [#allocation2], %s1647_s19 }
  0x60   : > { %s382_s15 = sshll.u32 %s372_s1, 4  ;;  %p2575_p4 = pnand %p1846_p3, %p2541_p1  ;;  %s383_s15 = int_to_ptr.vmem [resolvable:$true] %s382_s15 }
  0x61   : > { %s369_s23 = scalar_lea.sflag [#allocation3], %s368_s16  ;;  %s2203_s3 = scalar_lea.vmem %s383_s15, 512 }
  0x62   : > { %p2192_p7 = pneg %p2575_p4  ;;  %p2204_p8 = scmp.ne.s32.totalorder %s383_s15, %s2203_s3 }
  0x63   : > { %s2377_s4 = smov [#allocation2]  }
  0x64   : > { %p2206_p9 = pnand %p2204_p8, %p2192_p7  ;;  %s2208_s5 = sshll.u32 %s2377_s4, 4  ;;  %s2209_s5 = int_to_ptr.vmem [resolvable:$false] %s2208_s5 }
  0x65   : > { %s2210_s20 = scalar_lea.vmem %s2209_s5, 1024  ;;  %p2211_p5 = scmp.lt.s32.totalorder %s383_s15, %s2209_s5 }
  0x66   : > { %p2207_p11 = pneg %p2206_p9  ;;  %p2212_p10 = scmp.lt.s32.totalorder %s2210_s20, %s2203_s3 }
  0x68   : > { %p2213_p12 = por %p2212_p10, %p2211_p5 }
  0x6a   : > { %p2214_p13 = pnand %p2213_p12, %p2207_p11 }
  0x6c   : > { %2217 = shalt.err (!%p2214_p13)
}
  0x6d   : > { %s2378_s1 = smov 256   ;;  %s2379_s17 = smov 16  }
  0x6e   : > { %1830 = dma.hbm_to_vmem [thread:$0]  (!%p2575_p4), %s381_s26, 512, %s383_s15, %s369_s23, %s2378_s1, %s2378_s1, %s2379_s17  }
  0x6f   : > { %p2882_p1 = scmp.ne.s32.totalorder %s2868_s12, 0 }
  0x70   : > { %s2586_s16 = sand.u32 (!%p2882_p1), 1, %s2350_s28  }
  0x71   : > { %394 = sbr.rel (%p2882_p1) target bundleno = 601 (0x259), region = 44  ;;  %s1651_s4 = sshll.u32 (!%p2882_p1), %s2586_s16, 5 }
  0x72   : > { %s397_s5 = scalar_lea.sflag (!%p2882_p1), [#allocation3], %s2586_s16  ;;  %s2590_s3 = scalar_lea.vmem (!%p2882_p1), [#allocation2], %s1651_s4 }
  0x76   : > { %2321 = dma.done.wait (%p2547_p6), %s397_s5, 512  }
  0x77   : > { %2323 = vsyncadd (%p2547_p6), %s397_s5, 4294966784  ;;  %p2883_p3 = scmp.eq.s32.totalorder %s2463_s11, 0 }
  0x79   : > { %2325 = dma.done.wait (%p2883_p3), [#allocation6], 12384   ;;  %p2884_p4 = pmov %p2883_p3 }
  0x7a   : > { %p2885_p7 = pmov %p2883_p3 }
  0x7b   : > { %2327 = vsyncadd (%p2884_p4), [#allocation6], 4294954912 }
  0x7c   : > { %2329 = dma.done.wait (%p2885_p7), [#allocation9], 512   ;;  %p2886_p8 = pmov %p2883_p3 }
  0x7d   : > { %p2887_p9 = pmov %p2883_p3 }
  0x7e   : > { %2331 = vsyncadd (%p2886_p8), [#allocation9], 4294966784 }
  0x7f   : > { %2333 = dma.done.wait (%p2887_p9), [#allocation12], 256   ;;  %p2888_p11 = pmov %p2883_p3 }
  0x80   : > { %v1916_v0 = vld [vmem:[#allocation5 + $0x154] ss:$24 sps:$4 sm:$0xff]   ;;  %v1920_v2 = vld [vmem:[#allocation5 + $0x150] ss:$24 sps:$4 sm:$0xff]   ;;  %v1922_v4 = vld [vmem:[#allocation5 + $0x124] ss:$24 sps:$4 sm:$0xff]  }
  0x81   : > { %2335 = vsyncadd (%p2888_p11), [#allocation12], 4294967040  ;;  %v1918_v1 = vld [vmem:[#allocation5 + $0x15c] ss:$24 sps:$4 sm:$0xff]   ;;  %1090 = vmatprep.subr.bf16.mxu0 %v1916_v0  ;;  %v1921_v3 = vld [vmem:[#allocation5 + $0x158] ss:$24 sps:$4 sm:$0xff]  }
  0x82   : > { %1133 = vmatprep.subr.bf16.mxu1 %v1918_v1  ;;  %1091 = vmatpush1.bf16.msra.mxu0 %v1920_v2  ;;  %v1924_v5 = vld [vmem:[#allocation5 + $0x12c] ss:$24 sps:$4 sm:$0xff]   ;;  %v1926_v6 = vld [vmem:[#allocation5 + $0x120] ss:$24 sps:$4 sm:$0xff]   ;;  %v1930_v9 = vld [vmem:[#allocation5 + $0xfc] ss:$24 sps:$4 sm:$0xff]  }
  0x83   : > { %1134 = vmatpush1.bf16.msra.mxu1 %v1921_v3  ;;  %1092 = vmatprep.subr.bf16.mxu0 %v1922_v4  ;;  %v1927_v7 = vld [vmem:[#allocation5 + $0x128] ss:$24 sps:$4 sm:$0xff]   ;;  %v1928_v8 = vld [vmem:[#allocation5 + $0xf4] ss:$24 sps:$4 sm:$0xff]   ;;  %v1933_v11 = vld [vmem:[#allocation5 + $0xf8] ss:$24 sps:$4 sm:$0xff]  }
  0x84   : > { %1135 = vmatprep.subr.bf16.mxu1 %v1924_v5  ;;  %v1932_v10 = vld [vmem:[#allocation5 + $0xf0] ss:$24 sps:$4 sm:$0xff]   ;;  %v1934_v12 = vld [vmem:[#allocation5 + $0xc4] ss:$24 sps:$4 sm:$0xff]   ;;  %v1938_v14 = vld [vmem:[#allocation5 + $0xc0] ss:$24 sps:$4 sm:$0xff]  }
  0x85   : > { %v1936_v13 = vld [vmem:[#allocation5 + $0xcc] ss:$24 sps:$4 sm:$0xff]   ;;  %v1939_v15 = vld [vmem:[#allocation5 + $0xc8] ss:$24 sps:$4 sm:$0xff]   ;;  %v1942_v17 = vld [vmem:[#allocation5 + $0x9c] ss:$24 sps:$4 sm:$0xff]  }
  0x86   : > { %1093 = vmatpush1.bf16.msra.mxu0 %v1926_v6  ;;  %v1940_v16 = vld [vmem:[#allocation5 + $0x94] ss:$24 sps:$4 sm:$0xff]   ;;  %v1944_v18 = vld [vmem:[#allocation5 + $0x90] ss:$24 sps:$4 sm:$0xff]   ;;  %v1946_v20 = vld [vmem:[#allocation5 + $0x64] ss:$24 sps:$4 sm:$0xff]  }
  0x87   : > { %1136 = vmatpush1.bf16.msra.mxu1 %v1927_v7  ;;  %1094 = vmatprep.subr.bf16.mxu0 %v1928_v8  ;;  %v1945_v19 = vld [vmem:[#allocation5 + $0x98] ss:$24 sps:$4 sm:$0xff]   ;;  %v1948_v21 = vld [vmem:[#allocation5 + $0x6c] ss:$24 sps:$4 sm:$0xff]   ;;  %v1951_v23 = vld [vmem:[#allocation5 + $0x68] ss:$24 sps:$4 sm:$0xff]  }
  0x88   : > { %1137 = vmatprep.subr.bf16.mxu1 %v1930_v9  ;;  %v1950_v22 = vld [vmem:[#allocation5 + $0x60] ss:$24 sps:$4 sm:$0xff]   ;;  %v1952_v24 = vld [vmem:[#allocation5 + $0x34] ss:$24 sps:$4 sm:$0xff]   ;;  %v1956_v26 = vld [vmem:[#allocation5 + $0x30] ss:$24 sps:$4 sm:$0xff]  }
  0x89   : > { %v1954_v25 = vld [vmem:[#allocation5 + $0x3c] ss:$24 sps:$4 sm:$0xff]   ;;  %v1957_v27 = vld [vmem:[#allocation5 + $0x38] ss:$24 sps:$4 sm:$0xff]   ;;  %v1960_v29 = vld [vmem:[#allocation5 + $0xc] ss:$24 sps:$4 sm:$0xff]  }
  0x8a   : > { %1095 = vmatpush1.bf16.msra.mxu0 %v1932_v10  ;;  %v1958_v28 = vld [vmem:[#allocation5 + $0x4] ss:$24 sps:$4 sm:$0xff]   ;;  %v1962_v30 = vld [vmem:[#allocation5] ss:$24 sps:$4 sm:$0xff]   ;;  %v1964_v32 = vld [vmem:[#allocation5 + $0x2d4] ss:$24 sps:$4 sm:$0xff]  }
  0x8b   : > { %1138 = vmatpush1.bf16.msra.mxu1 %v1933_v11  ;;  %1096 = vmatprep.subr.bf16.mxu0 %v1934_v12  ;;  %v1963_v31 = vld [vmem:[#allocation5 + $0x8] ss:$24 sps:$4 sm:$0xff]   ;;  %v1966_v33 = vld [vmem:[#allocation5 + $0x2dc] ss:$24 sps:$4 sm:$0xff]   ;;  %v1969_v35 = vld [vmem:[#allocation5 + $0x2d8] ss:$24 sps:$4 sm:$0xff]  }
  0x8c   : > { %1139 = vmatprep.subr.bf16.mxu1 %v1936_v13  ;;  %v1968_v34 = vld [vmem:[#allocation5 + $0x2d0] ss:$24 sps:$4 sm:$0xff]   ;;  %v1970_v36 = vld [vmem:[#allocation5 + $0x2a4] ss:$24 sps:$4 sm:$0xff]   ;;  %v1974_v38 = vld [vmem:[#allocation5 + $0x2a0] ss:$24 sps:$4 sm:$0xff]  }
  0x8d   : > { %v1972_v37 = vld [vmem:[#allocation5 + $0x2ac] ss:$24 sps:$4 sm:$0xff]   ;;  %v1975_v39 = vld [vmem:[#allocation5 + $0x2a8] ss:$24 sps:$4 sm:$0xff]   ;;  %v1978_v41 = vld [vmem:[#allocation5 + $0x27c] ss:$24 sps:$4 sm:$0xff]  }
  0x8e   : > { %1097 = vmatpush1.bf16.msra.mxu0 %v1938_v14  ;;  %v1976_v40 = vld [vmem:[#allocation5 + $0x274] ss:$24 sps:$4 sm:$0xff]   ;;  %v1980_v42 = vld [vmem:[#allocation5 + $0x270] ss:$24 sps:$4 sm:$0xff]   ;;  %v1982_v44 = vld [vmem:[#allocation5 + $0x244] ss:$24 sps:$4 sm:$0xff]  }
  0x8f   : > { %1140 = vmatpush1.bf16.msra.mxu1 %v1939_v15  ;;  %1098 = vmatprep.subr.bf16.mxu0 %v1940_v16  ;;  %v1981_v43 = vld [vmem:[#allocation5 + $0x278] ss:$24 sps:$4 sm:$0xff]   ;;  %v1984_v45 = vld [vmem:[#allocation5 + $0x24c] ss:$24 sps:$4 sm:$0xff]   ;;  %v1987_v48 = vld [vmem:[#allocation5 + $0x248] ss:$24 sps:$4 sm:$0xff]  }
  0x90   : > { %1141 = vmatprep.subr.bf16.mxu1 %v1942_v17  ;;  %v477_v46 = vld [vmem:[%s2590_s3 + $0x8] sm:$0xff]  ;;  %v1986_v47 = vld [vmem:[#allocation5 + $0x240] ss:$24 sps:$4 sm:$0xff]   ;;  %v1990_v52 = vld [vmem:[#allocation5 + $0x21c] ss:$24 sps:$4 sm:$0xff]   ;;  %s2380_s2 = smov 1  }
  0x91   : > { %v479_v49 = vld [vmem:[%s2590_s3 + $0x18] sm:$0xff]  ;;  %v1988_v50 = vld [vmem:[#allocation5 + $0x214] ss:$24 sps:$4 sm:$0xff]   ;;  %v1992_v53 = vld [vmem:[#allocation5 + $0x210] ss:$24 sps:$4 sm:$0xff]   ;;  %s2381_s12 = smov 127  }
  0x92   : > { %1099 = vmatpush1.bf16.msra.mxu0 %v1944_v18  ;;  %v481_v51 = vpack.c.bf16 %v479_v49, %v477_v46  ;;  %v1993_v54 = vld [vmem:[#allocation5 + $0x218] ss:$24 sps:$4 sm:$0xff]   ;;  %v1994_v55 = vld [vmem:[#allocation5 + $0x1e4] ss:$24 sps:$4 sm:$0xff]   ;;  %v1999_v58 = vld [vmem:[#allocation5 + $0x1e8] ss:$24 sps:$4 sm:$0xff]  }
  0x93   : > { %1142 = vmatpush1.bf16.msra.mxu1 %v1945_v19  ;;  %1100 = vmatprep.subr.bf16.mxu0 %v1946_v20  ;;  %v1996_v56 = vld [vmem:[#allocation5 + $0x1ec] ss:$24 sps:$4 sm:$0xff]   ;;  %v1998_v57 = vld [vmem:[#allocation5 + $0x1e0] ss:$24 sps:$4 sm:$0xff]   ;;  %v2002_v60 = vld [vmem:[#allocation5 + $0x1bc] ss:$24 sps:$4 sm:$0xff]  }
  0x94   : > { %1143 = vmatprep.subr.bf16.mxu1 %v1948_v21  ;;  %1122 = vmatprep.mubr.bf16.mxu0 %v481_v51  ;;  %v2000_v59 = vld [vmem:[#allocation5 + $0x1b4] ss:$24 sps:$4 sm:$0xff]   ;;  %v2004_v61 = vld [vmem:[#allocation5 + $0x1b0] ss:$24 sps:$4 sm:$0xff]   ;;  %v2006_v63 = vld [vmem:[#allocation5 + $0x184] ss:$24 sps:$4 sm:$0xff]  }
  0x95   : > { %1165 = vmatprep.mubr.bf16.mxu1 %v481_v51  ;;  %v2005_v62 = vld [vmem:[#allocation5 + $0x1b8] ss:$24 sps:$4 sm:$0xff]   ;;  %v2008_v0 = vld [vmem:[#allocation5 + $0x18c] ss:$24 sps:$4 sm:$0xff]   ;;  %v2011_v2 = vld [vmem:[#allocation5 + $0x188] ss:$24 sps:$4 sm:$0xff]  }
  0x96   : > { %1101 = vmatpush1.bf16.msra.mxu0 %v1950_v22  ;;  %v2010_v1 = vld [vmem:[#allocation5 + $0x180] ss:$24 sps:$4 sm:$0xff]   ;;  %v478_v4 = vld [vmem:[%s2590_s3 + $0x10] sm:$0xff]  ;;  %v2014_v5 = vld [vmem:[#allocation5 + $0x164] ss:$24 sps:$4 sm:$0xff]   ;;  %s2647_s15 = sshll.u32 %s2586_s16, 4 }
  0x97   : > { %1144 = vmatpush1.bf16.msra.mxu1 %v1951_v23  ;;  %1102 = vmatprep.subr.bf16.mxu0 %v1952_v24  ;;  %v476_v3 = vld [vmem:[%s2590_s3] sm:$0xff]  ;;  %v2017_v8 = vld [vmem:[#allocation5 + $0x134] ss:$24 sps:$4 sm:$0xff]   ;;  %v2015_v9 = vld [vmem:[#allocation5 + $0x130] ss:$24 sps:$4 sm:$0xff]   ;;  %s2650_s25 = scalar_lea.vmem [#allocation16], %s2647_s15 }
  0x98   : > { %1145 = vmatprep.subr.bf16.mxu1 %v1954_v25  ;;  %v2612_v6 = vpack.c.bf16 %v478_v4, %v476_v3  ;;  %v2012_v7 = vld [vmem:[#allocation5 + $0x160] ss:$24 sps:$4 sm:$0xff]   ;;  %v2020_v10 = vld [vmem:[#allocation5 + $0x104] ss:$24 sps:$4 sm:$0xff]   ;;  %v2023_v12 = vld [vmem:[#allocation5 + $0xd4] ss:$24 sps:$4 sm:$0xff]  }
  0x99   : > { %v2018_v11 = vld [vmem:[#allocation5 + $0x100] ss:$24 sps:$4 sm:$0xff]   ;;  %v2021_v13 = vld [vmem:[#allocation5 + $0xd0] ss:$24 sps:$4 sm:$0xff]   ;;  %v2026_v14 = vld [vmem:[#allocation5 + $0xa4] ss:$24 sps:$4 sm:$0xff]  }
  0x9a   : > { %1103 = vmatpush1.bf16.msra.mxu0 %v1956_v26  ;;  %v2024_v15 = vld [vmem:[#allocation5 + $0xa0] ss:$24 sps:$4 sm:$0xff]   ;;  %v2029_v16 = vld [vmem:[#allocation5 + $0x74] ss:$24 sps:$4 sm:$0xff]   ;;  %v2027_v17 = vld [vmem:[#allocation5 + $0x70] ss:$24 sps:$4 sm:$0xff]  }
  0x9b   : > { %1146 = vmatpush1.bf16.msra.mxu1 %v1957_v27  ;;  %1104 = vmatprep.subr.bf16.mxu0 %v1958_v28  ;;  %v2032_v18 = vld [vmem:[#allocation5 + $0x44] ss:$24 sps:$4 sm:$0xff]   ;;  %v2030_v19 = vld [vmem:[#allocation5 + $0x40] ss:$24 sps:$4 sm:$0xff]   ;;  %v2035_v20 = vld [vmem:[#allocation5 + $0x14] ss:$24 sps:$4 sm:$0xff]  }
  0x9c   : > { %1147 = vmatprep.subr.bf16.mxu1 %v1960_v29  ;;  %v2033_v21 = vld [vmem:[#allocation5 + $0x10] ss:$24 sps:$4 sm:$0xff]   ;;  %v2038_v22 = vld [vmem:[#allocation5 + $0x2e4] ss:$24 sps:$4 sm:$0xff]   ;;  %v2036_v23 = vld [vmem:[#allocation5 + $0x2e0] ss:$24 sps:$4 sm:$0xff]  }
  0x9d   : > { %v2041_v24 = vld [vmem:[#allocation5 + $0x2b4] ss:$24 sps:$4 sm:$0xff]   ;;  %v2039_v25 = vld [vmem:[#allocation5 + $0x2b0] ss:$24 sps:$4 sm:$0xff]   ;;  %v2044_v26 = vld [vmem:[#allocation5 + $0x284] ss:$24 sps:$4 sm:$0xff]  }
  0x9e   : > { %1105 = vmatpush1.bf16.msra.mxu0 %v1962_v30  ;;  %v2042_v27 = vld [vmem:[#allocation5 + $0x280] ss:$24 sps:$4 sm:$0xff]   ;;  %v2047_v28 = vld [vmem:[#allocation5 + $0x254] ss:$24 sps:$4 sm:$0xff]   ;;  %v2045_v29 = vld [vmem:[#allocation5 + $0x250] ss:$24 sps:$4 sm:$0xff]  }
  0x9f   : > { %1148 = vmatpush1.bf16.msra.mxu1 %v1963_v31  ;;  %1106 = vmatprep.subr.bf16.mxu0 %v1964_v32  ;;  %v2050_v30 = vld [vmem:[#allocation5 + $0x224] ss:$24 sps:$4 sm:$0xff]   ;;  %v2048_v31 = vld [vmem:[#allocation5 + $0x220] ss:$24 sps:$4 sm:$0xff]   ;;  %v2053_v32 = vld [vmem:[#allocation5 + $0x1f4] ss:$24 sps:$4 sm:$0xff]  }
  0xa0   : > { %1149 = vmatprep.subr.bf16.mxu1 %v1966_v33  ;;  %v2051_v33 = vld [vmem:[#allocation5 + $0x1f0] ss:$24 sps:$4 sm:$0xff]   ;;  %s1430_s19 = sshll.u32 %s2650_s25, 4  ;;  %s2704_s22 = scalar_lea.vmem [#allocation14], %s2647_s15  ;;  %s2708_s19 = int_to_ptr.vmem [resolvable:$true] %s1430_s19 }
  0xa1   : > { %s1370_s21 = sand.u32 1, %s2463_s11   ;;  %s1780_s26 = sshll.u32 %s2358_s30, 8 }
  0xa2   : > { %1107 = vmatpush2.bf16.msra.mxu0 %v1968_v34  ;;  %v2056_v34 = vld [vmem:[#allocation5 + $0x1c4] ss:$24 sps:$4 sm:$0xff]   ;;  %s1411_s23 = sshll.u32 %s2704_s22, 4  ;;  %s2725_s20 = scalar_lea.vmem [#allocation13], %s2647_s15  ;;  %s2733_s23 = int_to_ptr.vmem [resolvable:$true] %s1411_s23 }
  0xa3   : > { %1150 = vmatpush2.bf16.msra.mxu1 %v1969_v35  ;;  %1108 = vmatprep.subr.bf16.mxu0 %v1970_v36  ;;  %v2054_v35 = vld [vmem:[#allocation5 + $0x1c0] ss:$24 sps:$4 sm:$0xff]   ;;  %v2059_v36 = vld [vmem:[#allocation5 + $0x194] ss:$24 sps:$4 sm:$0xff]   ;;  %s1392_s30 = sshll.u32 %s2725_s20, 4  ;;  %s2731_s4 = scalar_lea.hbm %s2858_s7, %s1780_s26  ;;  %s2746_s30 = int_to_ptr.vmem [resolvable:$true] %s1392_s30 }
  0xa4   : > { %1151 = vmatprep.subr.bf16.mxu1 %v1972_v37  ;;  %v2057_v37 = vld [vmem:[#allocation5 + $0x190] ss:$24 sps:$4 sm:$0xff]   ;;  %s2751_s1 = scalar_lea.sflag [#allocation15], %s1370_s21  ;;  %s2218_s17 = scalar_lea.vmem %s2733_s23, 256 }
  0xa5   : > { %p2219_p6 = scmp.ne.s32.totalorder %s2733_s23, %s2218_s17  ;;  %s2382_s5 = smov [#allocation14]  }
  0xa6   : > { %1109 = vmatpush2.bf16.msra.mxu0 %v1974_v38  ;;  %v580_v38 = vlaneseq  ;;  %s2222_s3 = sshll.u32 %s2382_s5, 4  ;;  %s2223_s3 = int_to_ptr.vmem [resolvable:$false] %s2222_s3 }
  0xa7   : > { %1152 = vmatpush2.bf16.msra.mxu1 %v1975_v39  ;;  %1110 = vmatprep.subr.bf16.mxu0 %v1976_v40  ;;  %p2220_p5 = pnand %p2219_p6, %p2556_p0  ;;  %p2225_p12 = scmp.lt.s32.totalorder %s2733_s23, %s2223_s3 }
  0xa8   : > { %1153 = vmatprep.subr.bf16.mxu1 %v1978_v41  ;;  %v581_v39 = vshrl.u32 %v580_v38, 7  ;;  %v578_v41 = vld [vmem:[#allocation7] sm:$0x3f] }
  0xa9   : > { %p2221_p10 = pneg %p2220_p5 }
  0xaa   : > { %1111 = vmatpush2.bf16.msra.mxu0 %v1980_v42  ;;  %v590_v40 = vsub.s32 2, %v581_v39  ;;  %v594_v42 = vsub.s32 3, %v581_v39 }
  0xab   : > { %1154 = vmatpush2.bf16.msra.mxu1 %v1981_v43  ;;  %1112 = vmatprep.subr.bf16.mxu0 %v1982_v44  ;;  %v582_v43 = vsub.s32 0, %v581_v39 }
  0xac   : > { %1155 = vmatprep.subr.bf16.mxu1 %v1984_v45  ;;  %v591_v44 = vrot.slane %v578_v41, %v590_v40  ;;  %v595_v45 = vrot.slane %v578_v41, %v594_v42 }
  0xae   : > { %1113 = vmatpush2.bf16.msra.mxu0 %v1986_v47 }
  0xaf   : > { %1156 = vmatpush2.bf16.msra.mxu1 %v1987_v48  ;;  %1114 = vmatprep.subr.bf16.mxu0 %v1988_v50  ;;  %v583_v48 = vrot.slane %v578_v41, %v582_v43 }
  0xb0   : > { %1157 = vmatprep.subr.bf16.mxu1 %v1990_v52 }
  0xb2   : > { %1115 = vmatpush2.bf16.msra.mxu0 %v1992_v53 }
  0xb3   : > { %1158 = vmatpush2.bf16.msra.mxu1 %v1993_v54  ;;  %1116 = vmatprep.subr.bf16.mxu0 %v1994_v55 }
  0xb4   : > { %1159 = vmatprep.subr.bf16.mxu1 %v1996_v56 }
  0xb6   : > { %1117 = vmatpush2.bf16.msra.mxu0 %v1998_v57  ;;  %v586_v57 = vsub.s32 1, %v581_v39 }
  0xb7   : > { %1160 = vmatpush2.bf16.msra.mxu1 %v1999_v58  ;;  %1118 = vmatprep.subr.bf16.mxu0 %v2000_v59 }
  0xb8   : > { %1161 = vmatprep.subr.bf16.mxu1 %v2002_v60  ;;  %v587_v59 = vrot.slane %v578_v41, %v586_v57 }
  0xba   : > { %1119 = vmatpush2.bf16.msra.mxu0 %v2004_v61 }
  0xbb   : > { %1162 = vmatpush2.bf16.msra.mxu1 %v2005_v62  ;;  %1120 = vmatprep.subr.bf16.mxu0 %v2006_v63 }
  0xbc   : > { %1163 = vmatprep.subr.bf16.mxu1 %v2008_v0 }
  0xbe   : > { %1121 = vmatpush2.bf16.msra.mxu0 %v2010_v1  ;;  %v598_v1 = vsub.s32 4, %v581_v39 }
  0xbf   : > { %1164 = vmatpush2.bf16.msra.mxu1 %v2011_v2  ;;  %1176 = vmatprep.subr.bf16.mxu0 %v2014_v5  ;;  %v602_v2 = vsub.s32 5, %v581_v39 }
  0xc0   : > { %v599_v3 = vrot.slane %v578_v41, %v598_v1 }
  0xc1   : > { %1123 = vmatmul.mubr.bf16.vlgmr.msra.gmra.mxu0 %v2612_v6  ;;  %v603_v4 = vrot.slane %v578_v41, %v602_v2 }
  0xc2   : > { %1166 = vmatmul.mubr.bf16.vlgmr.msra.gmra.mxu1 %v2612_v6  ;;  %1177 = vmatpush1.bf16.msra.mxu0 %v2012_v7 }
  0xc3   : > { %1208 = vmatprep.mubr.bf16.mxu0 %v481_v51  ;;  %1178 = vmatprep.subr.bf16.mxu0 %v2017_v8 }
  0xc6   : > { %1179 = vmatpush1.bf16.msra.mxu0 %v2015_v9 }
  0xc7   : > { %1180 = vmatprep.subr.bf16.mxu0 %v2020_v10 }
  0xca   : > { %1181 = vmatpush1.bf16.msra.mxu0 %v2018_v11 }
  0xcb   : > { %1182 = vmatprep.subr.bf16.mxu0 %v2023_v12 }
  0xce   : > { %1183 = vmatpush1.bf16.msra.mxu0 %v2021_v13 }
  0xcf   : > { %1184 = vmatprep.subr.bf16.mxu0 %v2026_v14 }
  0xd2   : > { %1185 = vmatpush1.bf16.msra.mxu0 %v2024_v15 }
  0xd3   : > { %1186 = vmatprep.subr.bf16.mxu0 %v2029_v16 }
  0xd6   : > { %1187 = vmatpush1.bf16.msra.mxu0 %v2027_v17 }
  0xd7   : > { %1188 = vmatprep.subr.bf16.mxu0 %v2032_v18 }
  0xda   : > { %1189 = vmatpush1.bf16.msra.mxu0 %v2030_v19  ;;  %v2655_v19 = vand.u32 127, %v580_v38 }
  0xdb   : > { %1190 = vmatprep.subr.bf16.mxu0 %v2035_v20 }
  0xdc   : > { %vm1229_vm0 = vcmp.lt.s32.totalorder %v2655_v19, 1  ;;  %vm1242_vm1 = vcmp.lt.s32.totalorder %v2655_v19, 127 }
  0xde   : > { %1191 = vmatpush1.bf16.msra.mxu0 %v2033_v21  ;;  %v472_v21 = vld [vmem:[#allocation10] sm:$0xff] }
  0xdf   : > { %1192 = vmatprep.subr.bf16.mxu0 %v2038_v22 }
  0xe2   : > { %1193 = vmatpush2.bf16.msra.mxu0 %v2036_v23  ;;  %v470_v23 = vld [vmem:[#allocation8] sm:$0xff] }
  0xe3   : > { %1194 = vmatprep.subr.bf16.mxu0 %v2041_v24 }
  0xe6   : > { %1195 = vmatpush2.bf16.msra.mxu0 %v2039_v25  ;;  %v471_v25 = vld [vmem:[#allocation8 + $0x8] sm:$0xff] }
  0xe7   : > { %1196 = vmatprep.subr.bf16.mxu0 %v2044_v26  ;;  %v1255_v26 = vunpack.c.l.bf16 %v472_v21 }
  0xea   : > { %1197 = vmatpush2.bf16.msra.mxu0 %v2042_v27  ;;  %v1256_v27 = vunpack.c.h.bf16 %v472_v21 }
  0xeb   : > { %1198 = vmatprep.subr.bf16.mxu0 %v2047_v28 }
  0xee   : > { %1199 = vmatpush2.bf16.msra.mxu0 %v2045_v29 }
  0xef   : > { %1200 = vmatprep.subr.bf16.mxu0 %v2050_v30  ;;  %v1247_v30 = vunpack.c.l.bf16 %v470_v23 }
  0xf2   : > { %1201 = vmatpush2.bf16.msra.mxu0 %v2048_v31  ;;  %v1248_v31 = vunpack.c.h.bf16 %v470_v23 }
  0xf3   : > { %1202 = vmatprep.subr.bf16.mxu0 %v2053_v32 }
  0xf6   : > { %1203 = vmatpush2.bf16.msra.mxu0 %v2051_v33  ;;  %v2668_v33 = vld [vmem:[#allocation11] sm:$0xff] }
  0xf7   : > { %1204 = vmatprep.subr.bf16.mxu0 %v2056_v34  ;;  %v1249_v34 = vunpack.c.l.bf16 %v471_v25  ;;  %v1267_v40 = vunpack.c.l.bf16 %v2668_v33  ;;  %v1268_v41 = vunpack.c.h.bf16 %v2668_v33 }
  0xfa   : > { %1205 = vmatpush2.bf16.msra.mxu0 %v2054_v35 }
  0xfb   : > { %1206 = vmatprep.subr.bf16.mxu0 %v2059_v36 }
  0xfe   : > { %1207 = vmatpush2.bf16.msra.mxu0 %v2057_v37  ;;  %v473_v37 = vld [vmem:[#allocation10 + $0x8] sm:$0xff] }
 0x101   : > { %1209 = vmatmul.mubr.bf16.vlgmr.msra.gmra.mxu0 %v2612_v6 }
 0x181   : > { %v1124_v46 = vpop.f32.mrf.mxu0 }
 0x182   : > { %v1167_v47 = vpop.f32.mrf.mxu1  ;;  %v2623_v54 = vadd.f32 %v1124_v46, %v583_v48 }
 0x183   : > { %v2618_v49 = vadd.f32 %v1167_v47, %v591_v44  ;;  %v1126_v50 = vpop.f32.mrf.mxu0 }
 0x184   : > { %v1169_v51 = vpop.f32.mrf.mxu1  ;;  %v1127_v61 = vadd.f32 %v1126_v50, %v587_v59  ;;  %v1251_v42 = vmul.f32 %v1247_v30, %v2623_v54 }
 0x185   : > { %v2620_v52 = vadd.f32 %v1169_v51, %v595_v45  ;;  %1293 = vrot.lane.b32.xlu0 %v2618_v49, %s2380_s2  ;;  %v1128_v53 = vpop.f32.mrf.mxu0  ;;  %v1317_v43 = vmul.f32 %v1247_v30, %v2618_v49  ;;  %v1257_v51 = vunpack.c.l.bf16 %v473_v37 }
 0x186   : > { %v2626_v55 = vadd.f32 %v1128_v53, %v583_v48  ;;  %v1171_v56 = vpop.f32.mrf.mxu1  ;;  %v475_v53 = vld [vmem:[#allocation11 + $0x8] sm:$0xff] }
 0x187   : > { %1297 = vrot.lane.b32.xlu1 %v2620_v52, %s2380_s2  ;;  %v2630_v58 = vadd.f32 %v1171_v56, %v591_v44  ;;  %v1130_v63 = vpop.f32.mrf.mxu0  ;;  %v1252_v44 = vmul.f32 %v1248_v31, %v1127_v61  ;;  %v1318_v46 = vmul.f32 %v1248_v31, %v2620_v52  ;;  %v1269_v1 = vunpack.c.l.bf16 %v475_v53 }
 0x188   : > { %v1173_v60 = vpop.f32.mrf.mxu1  ;;  %v2639_v0 = vadd.f32 %v1130_v63, %v587_v59  ;;  %v1253_v47 = vmul.f32 %v1249_v34, %v2626_v55  ;;  %v1258_v63 = vunpack.c.h.bf16 %v473_v37  ;;  %v1270_v2 = vunpack.c.h.bf16 %v475_v53 }
 0x189   : > { %1219 = vrot.lane.b32.xlu0 %v2623_v54, %s2380_s2  ;;  %v2636_v62 = vadd.f32 %v1173_v60, %v595_v45  ;;  %v1250_v45 = vunpack.c.h.bf16 %v471_v25  ;;  %v1319_v48 = vmul.f32 %v1249_v34, %v2630_v58 }
 0x18b   : > { %1221 = vrot.lane.b32.xlu1 %v2626_v55, %s2380_s2 }
 0x18d   : > { %1305 = vrot.lane.b32.xlu0 %v2618_v49, %s2381_s12 }
 0x18f   : > { %1307 = vrot.lane.b32.xlu1 %v2630_v58, %s2381_s12 }
 0x191   : > { %1234 = vrot.lane.b32.xlu0 %v2623_v54, %s2381_s12 }
 0x193   : > { %1236 = vrot.lane.b32.xlu1 %v2626_v55, %s2381_s12 }
 0x195   : > { %1223 = vrot.lane.b32.xlu0 %v1127_v61, %s2380_s2 }
 0x197   : > { %1299 = vrot.lane.b32.xlu1 %v2636_v62, %s2380_s2 }
 0x199   : > { %1309 = vrot.lane.b32.xlu0 %v2620_v52, %s2381_s12 }
 0x19b   : > { %1225 = vrot.lane.b32.xlu1 %v2639_v0, %s2380_s2 }
 0x19d   : > { %1295 = vrot.lane.b32.xlu0 %v2630_v58, %s2380_s2  ;;  %s2738_s2 = scalar_lea.hbm %s2859_s8, %s1780_s26 }
 0x19f   : > { %1311 = vrot.lane.b32.xlu1 %v2636_v62, %s2381_s12 }
 0x1a1   : > { %1238 = vrot.lane.b32.xlu0 %v1127_v61, %s2381_s12 }
 0x1a3   : > { %1240 = vrot.lane.b32.xlu1 %v2639_v0, %s2381_s12 }
 0x1c1   : > { %v1210_v5 = vpop.f32.mrf.mxu0 }
 0x1c2   : > { %v1211_v6 = vadd.f32 %v1210_v5, %v599_v3 }
 0x1c3   : > { %v1212_v7 = vpop.f32.mrf.mxu0 }
 0x1c4   : > { %v1213_v8 = vadd.f32 %v1212_v7, %v603_v4 }
 0x1c5   : > { %v1214_v9 = vpop.f32.mrf.mxu0 }
 0x1c6   : > { %v1778_v10 = vpack.c.bf16 %v1213_v8, %v1211_v6  ;;  %v1215_v11 = vadd.f32 %v1214_v9, %v599_v3  ;;  %v1254_v8 = vmul.f32 %v1250_v45, %v2639_v0 }
 0x1c7   : > { %v1216_v12 = vpop.f32.mrf.mxu0 }
 0x1c8   : > { %1363 = vst [vmem:[%s2650_s25] sm:$0xff] %v1778_v10  ;;  %v1217_v13 = vadd.f32 %v1216_v12, %v603_v4  ;;  %v1320_v12 = vmul.f32 %v1250_v45, %v2636_v62 }
 0x1ca   : > { %v1779_v14 = vpack.c.bf16 %v1217_v13, %v1215_v11 }
 0x1cc   : > { %1364 = vst [vmem:[%s2650_s25 + $0x8] sm:$0xff] %v1779_v14  ;;  %s2744_s25 = scalar_lea.hbm %s2857_s6, %s1780_s26 }
 0x1f7   : > { %v1294_v15 = vpop.permute.xlu0 %1293 }
 0x1f9   : > { %v1298_v16 = vpop.permute.xlu1 %1297 }
 0x1fa   : > { %v1303_v28 = vsel %vm1229_vm0, %v1298_v16, %v1294_v15  ;;  %v1301_v32 = vsel %vm1229_vm0, %v1294_v15, %v1298_v16 }
 0x1fb   : > { %v1220_v17 = vpop.permute.xlu0 %1219  ;;  %v1321_v36 = vmul.f32 %v1303_v28, %v1255_v26  ;;  %v1322_v38 = vmul.f32 %v1301_v32, %v1256_v27 }
 0x1fd   : > { %v1222_v18 = vpop.permute.xlu1 %1221  ;;  %v1325_v56 = vadd.f32 %v1321_v36, %v1317_v43  ;;  %v1326_v59 = vadd.f32 %v1322_v38, %v1318_v46 }
 0x1ff   : > { %v1306_v20 = vpop.permute.xlu0 %1305 }
 0x201   : > { %v2657_v22 = vpop.permute.xlu1 %1307 }
 0x203   : > { %v2660_v24 = vpop.permute.xlu0 %1234 }
 0x205   : > { %v2664_v29 = vpop.permute.xlu1 %1236 }
 0x207   : > { %v1224_v35 = vpop.permute.xlu0 %1223 }
 0x208   : > { %v1232_v57 = vsel %vm1229_vm0, %v1224_v35, %v1220_v17  ;;  %v1230_v52 = vsel %vm1229_vm0, %v1220_v17, %v1224_v35 }
 0x209   : > { %v1300_v39 = vpop.permute.xlu1 %1299  ;;  %v1259_v3 = vmul.f32 %v1255_v26, %v1232_v57  ;;  %v1260_v9 = vmul.f32 %v1256_v27, %v1230_v52 }
 0x20b   : > { %v1310_v50 = vpop.permute.xlu0 %1309  ;;  %v1263_v21 = vadd.f32 %v1259_v3, %v1251_v42  ;;  %v1264_v27 = vadd.f32 %v1260_v9, %v1252_v44 }
 0x20c   : > { %v1313_v54 = vsel %vm1242_vm1, %v1306_v20, %v1310_v50  ;;  %v1315_v49 = vsel %vm1242_vm1, %v1310_v50, %v1306_v20 }
 0x20d   : > { %v1329_v55 = vmul.f32 %v1313_v54, %v1267_v40  ;;  %v1330_v60 = vmul.f32 %v1315_v49, %v1268_v41  ;;  %v1226_v58 = vpop.permute.xlu1 %1225 }
 0x20e   : > { %v1233_v61 = vsel %vm1229_vm0, %v1226_v58, %v1222_v18  ;;  %v1231_v6 = vsel %vm1229_vm0, %v1222_v18, %v1226_v58 }
 0x20f   : > { %v1333_v4 = vadd.f32 %v1329_v55, %v1325_v56  ;;  %v1334_v5 = vadd.f32 %v1330_v60, %v1326_v59  ;;  %v1296_v7 = vpop.permute.xlu0 %1295  ;;  %v1261_v14 = vmul.f32 %v1257_v51, %v1233_v61  ;;  %v1262_v17 = vmul.f32 %v1258_v63, %v1231_v6 }
 0x210   : > { %v1302_v10 = vsel %vm1229_vm0, %v1296_v7, %v1300_v39  ;;  %v1304_v11 = vsel %vm1229_vm0, %v1300_v39, %v1296_v7 }
 0x211   : > { %v1776_v13 = vpack.c.bf16 %v1334_v5, %v1333_v4  ;;  %v1323_v15 = vmul.f32 %v1304_v11, %v1257_v51  ;;  %v1312_v16 = vpop.permute.xlu1 %1311  ;;  %v1324_v18 = vmul.f32 %v1302_v10, %v1258_v63  ;;  %v1265_v31 = vadd.f32 %v1261_v14, %v1253_v47 }
 0x212   : > { %v1314_v0 = vsel %vm1242_vm1, %v2657_v22, %v1312_v16  ;;  %v1316_v20 = vsel %vm1242_vm1, %v1312_v16, %v2657_v22  ;;  %v1266_v36 = vadd.f32 %v1262_v17, %v1254_v8 }
 0x213   : > { %1349 = vst [vmem:[%s2704_s22] sm:$0xff] %v1776_v13  ;;  %v1327_v62 = vadd.f32 %v1323_v15, %v1319_v48  ;;  %v1331_v23 = vmul.f32 %v1314_v0, %v1269_v1  ;;  %v1332_v25 = vmul.f32 %v1316_v20, %v1270_v2  ;;  %v1239_v26 = vpop.permute.xlu0 %1238  ;;  %v1328_v28 = vadd.f32 %v1324_v18, %v1320_v12 }
 0x214   : > { %v1243_v22 = vsel %vm1242_vm1, %v2660_v24, %v1239_v26  ;;  %v1245_v30 = vsel %vm1242_vm1, %v1239_v26, %v2660_v24 }
 0x215   : > { %v1335_v32 = vadd.f32 %v1331_v23, %v1327_v62  ;;  %v1271_v33 = vmul.f32 %v1267_v40, %v1243_v22  ;;  %v1272_v34 = vmul.f32 %v1268_v41, %v1245_v30  ;;  %v1241_v35 = vpop.permute.xlu1 %1240  ;;  %v1336_v37 = vadd.f32 %v1332_v25, %v1328_v28 }
 0x216   : > { %v1244_v38 = vsel %vm1242_vm1, %v2664_v29, %v1241_v35  ;;  %v1246_v39 = vsel %vm1242_vm1, %v1241_v35, %v2664_v29 }
 0x217   : > { %v1275_v24 = vadd.f32 %v1271_v33, %v1263_v21  ;;  %v1276_v42 = vadd.f32 %v1272_v34, %v1264_v27  ;;  %v1273_v43 = vmul.f32 %v1269_v1, %v1244_v38  ;;  %v1274_v40 = vmul.f32 %v1270_v2, %v1246_v39 }
 0x218   : > { %v1777_v41 = vpack.c.bf16 %v1336_v37, %v1335_v32 }
 0x219   : > { %v1774_v19 = vpack.c.bf16 %v1276_v42, %v1275_v24  ;;  %v1277_v29 = vadd.f32 %v1273_v43, %v1265_v31  ;;  %v1278_v44 = vadd.f32 %v1274_v40, %v1266_v36 }
 0x21a   : > { %1350 = vst [vmem:[%s2704_s22 + $0x8] sm:$0xff] %v1777_v41  ;;  %s2224_s22 = scalar_lea.vmem %s2223_s3, 512 }
 0x21b   : > { %1291 = vst [vmem:[%s2725_s20] sm:$0xff] %v1774_v19  ;;  %v1775_v45 = vpack.c.bf16 %v1278_v44, %v1277_v29  ;;  %p2226_p13 = scmp.lt.s32.totalorder %s2224_s22, %s2218_s17 }
 0x21d   : > { %p2227_p1 = por %p2226_p13, %p2225_p12 }
 0x21f   : > { %p2228_p3 = pnand %p2227_p1, %p2221_p10 }
 0x221   : > { %2231 = shalt.err (!%p2228_p3)
}
 0x222   : > { %s2232_s11 = scalar_lea.hbm %s2731_s4, 256  ;;  %s2236_s12 = scalar_lea.hbm %s2858_s7, 512 }
 0x223   : > { %p2233_p4 = scmp.ne.s32.totalorder %s2731_s4, %s2232_s11  ;;  %p2237_p9 = scmp.lt.s32.totalorder %s2731_s4, %s2858_s7 }
 0x224   : > { %p2238_p11 = scmp.lt.s32.totalorder %s2236_s12, %s2232_s11 }
 0x225   : > { %p2234_p7 = pnand %p2233_p4, %p2556_p0 }
 0x226   : > { %p2239_p6 = por %p2238_p11, %p2237_p9 }
 0x227   : > { %p2235_p8 = pneg %p2234_p7 }
 0x229   : > { %p2240_p5 = pnand %p2239_p6, %p2235_p8 }
 0x22b   : > { %2243 = shalt.err (!%p2240_p5)
}
 0x22c   : > { %s2383_s17 = smov 128   ;;  %s2384_s3 = smov 8  }
 0x22d   : > { %1806 = dma.vmem_to_hbm [thread:$0]  (%p2556_p0), %s2733_s23, 256, %s2731_s4, %s2751_s1, %s2383_s17, %s2383_s17, %s2384_s3  }
 0x22e   : > { %s2244_s22 = scalar_lea.vmem %s2708_s19, 256  ;;  %s2385_s11 = smov [#allocation16]  }
 0x22f   : > { %p2245_p10 = scmp.ne.s32.totalorder %s2708_s19, %s2244_s22  ;;  %s2248_s21 = sshll.u32 %s2385_s11, 4  ;;  %s2249_s21 = int_to_ptr.vmem [resolvable:$false] %s2248_s21 }
 0x230   : > { %s2250_s26 = scalar_lea.vmem %s2249_s21, 512  ;;  %p2251_p1 = scmp.lt.s32.totalorder %s2708_s19, %s2249_s21 }
 0x231   : > { %p2246_p12 = pnand %p2245_p10, %p2556_p0  ;;  %p2252_p3 = scmp.lt.s32.totalorder %s2250_s26, %s2244_s22 }
 0x233   : > { %p2247_p13 = pneg %p2246_p12  ;;  %p2253_p4 = por %p2252_p3, %p2251_p1 }
 0x235   : > { %p2254_p7 = pnand %p2253_p4, %p2247_p13 }
 0x237   : > { %2257 = shalt.err (!%p2254_p7)
}
 0x238   : > { %s2258_s12 = scalar_lea.hbm %s2738_s2, 256  ;;  %s2262_s15 = scalar_lea.hbm %s2859_s8, 512 }
 0x239   : > { %p2259_p8 = scmp.ne.s32.totalorder %s2738_s2, %s2258_s12  ;;  %p2263_p6 = scmp.lt.s32.totalorder %s2738_s2, %s2859_s8 }
 0x23a   : > { %p2264_p5 = scmp.lt.s32.totalorder %s2262_s15, %s2258_s12 }
 0x23b   : > { %p2260_p9 = pnand %p2259_p8, %p2556_p0 }
 0x23c   : > { %p2265_p10 = por %p2264_p5, %p2263_p6 }
 0x23d   : > { %p2261_p11 = pneg %p2260_p9 }
 0x23f   : > { %p2266_p12 = pnand %p2265_p10, %p2261_p11 }
 0x241   : > { %2269 = shalt.err (!%p2266_p12)
}
 0x242   : > { %1807 = dma.vmem_to_hbm [thread:$0]  (%p2556_p0), %s2708_s19, 256, %s2738_s2, %s2751_s1, %s2383_s17, %s2383_s17, %s2384_s3  }
 0x243   : > { %1292 = vst [vmem:[%s2725_s20 + $0x8] sm:$0xff] %v1775_v45  ;;  %s1366_s22 = scalar_lea.sflag [#allocation4], %s2586_s16  ;;  %s2270_s21 = scalar_lea.vmem %s2746_s30, 256 }
 0x244   : > { %p2271_p13 = scmp.ne.s32.totalorder %s2746_s30, %s2270_s21  ;;  %s2386_s26 = smov [#allocation13]  }
 0x245   : > { %s2274_s12 = sshll.u32 %s2386_s26, 4  ;;  %s2275_s12 = int_to_ptr.vmem [resolvable:$false] %s2274_s12 }
 0x246   : > { %p2272_p1 = pnand %p2271_p13, %p2556_p0  ;;  %s2276_s23 = scalar_lea.vmem %s2275_s12, 512 }
 0x247   : > { %p2277_p4 = scmp.lt.s32.totalorder %s2746_s30, %s2275_s12  ;;  %p2278_p7 = scmp.lt.s32.totalorder %s2276_s23, %s2270_s21 }
 0x248   : > { %p2273_p3 = pneg %p2272_p1 }
 0x249   : > { %p2279_p8 = por %p2278_p7, %p2277_p4 }
 0x24b   : > { %p2280_p9 = pnand %p2279_p8, %p2273_p3 }
 0x24d   : > { %2283 = shalt.err (!%p2280_p9)
}
 0x24e   : > { %s2284_s19 = scalar_lea.hbm %s2744_s25, 256  ;;  %s2288_s2 = scalar_lea.hbm %s2857_s6, 512 }
 0x24f   : > { %p2285_p11 = scmp.ne.s32.totalorder %s2744_s25, %s2284_s19  ;;  %p2289_p10 = scmp.lt.s32.totalorder %s2744_s25, %s2857_s6 }
 0x250   : > { %p2290_p12 = scmp.lt.s32.totalorder %s2288_s2, %s2284_s19 }
 0x251   : > { %p2286_p6 = pnand %p2285_p11, %p2556_p0 }
 0x252   : > { %p2291_p13 = por %p2290_p12, %p2289_p10 }
 0x253   : > { %p2287_p5 = pneg %p2286_p6 }
 0x255   : > { %p2292_p1 = pnand %p2291_p13, %p2287_p5 }
 0x257   : > { %2295 = shalt.err (!%p2292_p1)
}
 0x258   : > { %1805 = dma.vmem_to_hbm [thread:$0]  (%p2556_p0), %s2746_s30, 256, %s2744_s25, %s1366_s22, %s2383_s17, %s2383_s17, %s2384_s3  }
 0x259 PF: > { %s1445_s15 = sand.u32 1, %s2346_s27   ;;  %p2889_p3 = scmp.ge.s32.totalorder %s2366_s10, 2 }
 0x25a   : > { %s1446_s5 = scalar_lea.sflag [#allocation4], %s1445_s15 }
 0x25b   : > { %p1832_p4 = pnand %p2889_p3, %p2564_p2 }
 0x25d   : > { %p1833_p7 = pneg %p1832_p4 }
 0x25f   : > { %2337 = dma.done.wait (%p1833_p7), %s1446_s5, 256  }
 0x260   : > { %2339 = vsyncadd (%p1833_p7), %s1446_s5, 4294967040  ;;  %s2890_s24 = sadd.s32 4294967294, %s2366_s10  }
 0x261   : > { %s1454_s11 = sand.u32 1, %s2890_s24  }
 0x262   : > { %s1455_s21 = scalar_lea.sflag [#allocation15], %s1454_s11 }
 0x263   : > { %2341 = dma.done.wait (%p1833_p7), %s1455_s21, 512  }
 0x264   : > { %2343 = vsyncadd (%p1833_p7), %s1455_s21, 4294966784  ;;  %s31_s10 = sadd.s32 1, %s2366_s10   ;;  %s2891_s27 = smov %s2350_s28 }
 0x265   : > { %p28_p0 = scmp.ge.s32.totalorder %s31_s10, 4   ;;  %s2892_s28 = smov %s2354_s29 }
 0x266   : > { %s2893_s29 = smov %s2562_s13  ;;  %s2894_s30 = smov %s2362_s9 }
 0x267   : > { %s2895_s9 = smov %s2897_s18  ;;  %30 = sbr.rel (!%p28_p0) target bundleno = 17 (0x11), region = 144 }
 0x26c   :  { %1469 = vsyncpa [#allocation3], 1 }
 0x26d   :  { %1471 = vsyncpa [#allocation3 + $0x1], 1 }
 0x26e   :  { %1472 = vsyncpa [#allocation6], 1 }
 0x26f   :  { %1473 = vsyncpa [#allocation9], 1 }
 0x270   :  { %1474 = vsyncpa [#allocation12], 1 }
 0x271   :  { %1475 = vsyncpa [#allocation4], 1 }
 0x272   :  { %1477 = vsyncpa [#allocation4 + $0x1], 1 }
 0x273   :  { %1478 = vsyncpa [#allocation15], 1 }
 0x274   :  { %1480 = vsyncpa [#allocation15 + $0x1], 1 }

</bundles_post_ra>
